<compile_context>
chip_gen: v6e
topology: v6e:2x2x1
jax: 0.10.0
libtpu: 0.0.40
codegen_flags: <defaults>
</compile_context>

<pallas_src>
import functools

import jax
import jax.numpy as jnp
from jax.experimental import pallas as pl
from jax.experimental.pallas import tpu as pltpu


def _round_up(a, b):
    return ((a + b - 1) // b) * b


# ---------------------------------------------------------------------------
# Kernels
# ---------------------------------------------------------------------------
def _linear_kernel(x_ref, w_ref, b_ref, o_ref):
    """Single-K-step linear tile: o = x @ w + b  (w already in (K, N) layout)."""
    acc = jnp.dot(x_ref[...], w_ref[...], preferred_element_type=jnp.float32)
    o_ref[...] = (acc + b_ref[...]).astype(o_ref.dtype)


def _linear_kernel_kacc(x_ref, w_ref, b_ref, o_ref, acc_ref):
    """K-tiled linear tile with f32 VMEM accumulator (K is grid axis 2)."""
    @pl.when(pl.program_id(2) == 0)
    def _init():
        acc_ref[...] = jnp.zeros_like(acc_ref)

    acc_ref[...] += jnp.dot(x_ref[...], w_ref[...],
                            preferred_element_type=jnp.float32)

    @pl.when(pl.program_id(2) == pl.num_programs(2) - 1)
    def _fini():
        o_ref[...] = (acc_ref[...] + b_ref[...]).astype(o_ref.dtype)


# ---------------------------------------------------------------------------
# Hardware query (cached)
# ---------------------------------------------------------------------------
_VMEM_CAP = None


def _vmem_capacity_bytes():
    global _VMEM_CAP
    if _VMEM_CAP is None:
        try:
            _VMEM_CAP = int(pltpu.get_tpu_info().vmem_capacity_bytes)
        except Exception:
            _VMEM_CAP = 64 << 20  # conservative fallback (v7x per-TC VMEM)
    return _VMEM_CAP


# ---------------------------------------------------------------------------
# One-time parameter preparation (hoisted out of the forward pass)
# ---------------------------------------------------------------------------
def prepare_classifier_params(weight, bias, *, compute_dtype=jnp.float32):
    """Prepare nn.Linear params once:
      * transpose weight to (input_dim, output_dim)  -> MXU-native contraction
      * zero-pad output_dim up to a multiple of 128   -> lane-dense stores
      * one-time cast (use jnp.bfloat16 on v6e/v7x for ~2x DMA / MXU throughput;
        default f32 matches the PyTorch reference exactly).
    Returns (weight_t (K, n_pad), bias_row (1, n_pad)).
    """
    output_dim, input_dim = weight.shape
    n_pad = _round_up(output_dim, 128)
    w_t = jnp.asarray(weight).T.astype(compute_dtype)          # (K, N)
    b_p = jnp.asarray(bias).astype(jnp.float32)
    if n_pad != output_dim:
        w_t = jnp.pad(w_t, ((0, 0), (0, n_pad - output_dim)))
        b_p = jnp.pad(b_p, (0, n_pad - output_dim))
    return w_t, b_p.reshape(1, n_pad)


# ---------------------------------------------------------------------------
# Forward pass
# ---------------------------------------------------------------------------
@functools.partial(jax.jit, static_argnames=("output_dim",))
def classifier_forward(x, weight_t, bias_row, output_dim):
    """y = x @ W^T + b (PyTorch nn.Linear semantics).

    x:        (..., input_dim)
    weight_t: (input_dim, n_pad)   from prepare_classifier_params
    bias_row: (1, n_pad)           from prepare_classifier_params
    returns   (..., output_dim)    in x.dtype
    """
    *lead, input_dim = x.shape
    x2 = x.reshape(-1, input_dim)
    batch = x2.shape[0]
    k_w, n_pad = weight_t.shape
    assert k_w == input_dim

    comp_dtype = weight_t.dtype
    out_dtype = x.dtype
    in_bytes = jnp.dtype(comp_dtype).itemsize
    out_bytes = jnp.dtype(out_dtype).itemsize

    # ---- generation-aware VMEM budget -------------------------------------
    cap = _vmem_capacity_bytes()
    budget = max(32 << 20, min(100 << 20, cap - (24 << 20)))

    def vmem_bytes(tm, tn, tk, with_acc):
        return (2 * tm * tk * in_bytes            # x tile (double-buffered)
                + 2 * tk * tn * in_bytes          # w tile
                + 2 * tn * 4                      # bias tile
                + 2 * tm * tn * out_bytes         # output tile
                + (tm * tn * 4 if with_acc else 0)  # f32 accumulator scratch
                + (2 << 20))                      # Mosaic internal scratch margin

    # ---- balanced M / N tiles ----------------------------------------------
    tm_target, tn_target, tk_target = 512, 512, 2048
    gm = pl.cdiv(batch, tm_target)
    tm = _round_up(max(pl.cdiv(batch, gm), 1), 8)
    gn = pl.cdiv(n_pad, tn_target)
    tn = _round_up(pl.cdiv(n_pad, gn), 128)
    gm, gn = pl.cdiv(batch, tm), pl.cdiv(n_pad, tn)

    # keep both v7x TensorCores busy if the parallel grid collapsed to one step
    if gm * gn == 1:
        if batch > 8:
            tm = _round_up(pl.cdiv(batch, 2), 8)
            gm = pl.cdiv(batch, tm)
        elif n_pad >= 256:
            tn = _round_up(pl.cdiv(n_pad, 2), 128)
            gn = pl.cdiv(n_pad, tn)

    # ---- K tiling (decouples VMEM footprint from input_dim) ----------------
    tk, gk = input_dim, 1
    if vmem_bytes(tm, tn, input_dim, False) > budget:
        if input_dim % 128 == 0 and input_dim > 128:
            units = input_dim // 128
            best = 1
            for d in range(1, units + 1):
                if (units % d == 0 and d * 128 <= tk_target
                        and vmem_bytes(tm, tn, d * 128, True) <= budget):
                    best = d
            tk, gk = 128 * best, units // best
        # TODO(synk): if input_dim is large and not a multiple of 128 we fall back to
        # shrinking M/N tiles instead of padding K per call.
        while vmem_bytes(tm, tn, tk, gk > 1) > budget and (tn > 128 or tm > 8):
            if tn > 256:
                tn = _round_up(tn // 2, 128)
            elif tm > 256:
                tm = _round_up(tm // 2, 8)
            elif tn > 128:
                tn = _round_up(tn // 2, 128)
            else:
                tm = max(8, _round_up(tm // 2, 8))
        gm, gn = pl.cdiv(batch, tm), pl.cdiv(n_pad, tn)

    x_p = x2.astype(comp_dtype) if x2.dtype != comp_dtype else x2

    # ---- grid ordering: keep the bigger operand resident across inner axis --
    w_total = k_w * n_pad * in_bytes
    x_total = batch * input_dim * in_bytes
    if w_total > x_total:
        # weight block index constant across consecutive (inner = batch) steps
        grid = (gn, gm, gk)
        x_map = lambda j, i, k: (i, k)
        w_map = lambda j, i, k: (k, j)
        b_map = lambda j, i, k: (0, j)
        o_map = lambda j, i, k: (i, j)
    else:
        # x block index constant across consecutive (inner = output) steps
        grid = (gm, gn, gk)
        x_map = lambda i, j, k: (i, k)
        w_map = lambda i, j, k: (k, j)
        b_map = lambda i, j, k: (0, j)
        o_map = lambda i, j, k: (i, j)

    use_acc = gk > 1
    kernel = _linear_kernel_kacc if use_acc else _linear_kernel
    scratch = [pltpu.VMEM((tm, tn), jnp.float32)] if use_acc else []

    vmem_limit = int(min(cap - (2 << 20),
                         max(vmem_bytes(tm, tn, tk, use_acc) + (8 << 20), 32 << 20)))

    y_full = pl.pallas_call(
        kernel,
        out_shape=jax.ShapeDtypeStruct((batch, n_pad), out_dtype),
        grid_spec=pltpu.PrefetchScalarGridSpec(
            num_scalar_prefetch=0,
            grid=grid,
            in_specs=[
                pl.BlockSpec((tm, tk), x_map),     # activations
                pl.BlockSpec((tk, tn), w_map),     # weight in (K, N) layout
                pl.BlockSpec((1, tn), b_map),      # bias row
            ],
            out_specs=pl.BlockSpec((tm, tn), o_map),
            scratch_shapes=scratch,
        ),
        compiler_params=pltpu.CompilerParams(
            dimension_semantics=("parallel", "parallel", "arbitrary"),
            vmem_limit_bytes=vmem_limit,
        ),
    )(x_p, weight_t, bias_row)

    y = y_full[:, :output_dim] if n_pad != output_dim else y_full
    return y.reshape(*lead, output_dim)


# ---------------------------------------------------------------------------
# Parameter init (mimics PyTorch nn.Linear defaults)
# ---------------------------------------------------------------------------
def init_classifier_params(key, input_dim, output_dim):
    kw, kb = jax.random.split(key)
    bound = 1.0 / jnp.sqrt(jnp.float32(input_dim))
    weight = jax.random.uniform(
        kw, (output_dim, input_dim), jnp.float32, minval=-bound, maxval=bound)
    bias = jax.random.uniform(
        kb, (output_dim,), jnp.float32, minval=-bound, maxval=bound)
    return weight, bias


if __name__ == "__main__":
    key = jax.random.PRNGKey(0)
    k_x, k_params = jax.random.split(key)

    batch, input_dim, output_dim = 16, 32, 16
    x = jax.random.normal(k_x, (batch, input_dim), jnp.float32)
    weight, bias = init_classifier_params(k_params, input_dim, output_dim)

    # one-time prep (transpose + N-pad + optional cast), then the Pallas forward
    w_prep, b_prep = prepare_classifier_params(weight, bias)
    y = classifier_forward(x, w_prep, b_prep, output_dim=output_dim)
    y = jax.block_until_ready(y)

    # correctness check against plain-JAX reference of nn.Linear
    y_ref = x @ weight.T + bias
    assert y.shape == (batch, output_dim)
    assert jnp.allclose(y, y_ref, atol=1e-5, rtol=1e-5)

    print("KERNEL_OK")
</pallas_src>

<mosaic_0001>
module attributes {stable_mosaic.version = 11 : i64} {
  func.func @_linear_kernel(%arg0: i32, %arg1: i32, %arg2: i32, %arg3: memref<8x32xf32, #tpu.memory_space<vmem>>, %arg4: memref<32x128xf32, #tpu.memory_space<vmem>>, %arg5: memref<1x128xf32, #tpu.memory_space<vmem>>, %arg6: memref<8x128xf32, #tpu.memory_space<vmem>>) attributes {dimension_semantics = [#tpu.dimension_semantics<parallel>, #tpu.dimension_semantics<parallel>, #tpu.dimension_semantics<arbitrary>], iteration_bounds = array<i64: 1, 2, 1>, scalar_prefetch = 0 : i64, scratch_operands = 0 : i64, tpu.core_type = #tpu.core_type<tc>, window_params = [{transform_indices = @transform_0, window_bounds = array<i64: 8, 32>}, {transform_indices = @transform_1, window_bounds = array<i64: 32, 128>}, {transform_indices = @transform_2, window_bounds = array<i64: 1, 128>}, {transform_indices = @transform_3, window_bounds = array<i64: 8, 128>}]} {
    %c0 = arith.constant 0 : index
    %c0_0 = arith.constant 0 : index
    %0 = vector.load %arg3[%c0, %c0_0] : memref<8x32xf32, #tpu.memory_space<vmem>>, vector<8x32xf32>
    %c0_1 = arith.constant 0 : index
    %c0_2 = arith.constant 0 : index
    %1 = vector.load %arg4[%c0_1, %c0_2] : memref<32x128xf32, #tpu.memory_space<vmem>>, vector<32x128xf32>
    %cst = arith.constant dense<0.000000e+00> : vector<8x128xf32>
    %2 = tpu.matmul %0, %1, %cst {dimension_numbers = #tpu.dot_dimension_numbers<[1], [0], [0], [1], [0, 0, 1, 1], [], []>} : vector<8x32xf32>, vector<32x128xf32>, vector<8x128xf32> -> vector<8x128xf32>
    %c0_3 = arith.constant 0 : index
    %c0_4 = arith.constant 0 : index
    %3 = vector.load %arg5[%c0_3, %c0_4] : memref<1x128xf32, #tpu.memory_space<vmem>>, vector<1x128xf32>
    %4 = vector.broadcast %3 : vector<1x128xf32> to vector<8x128xf32>
    %5 = arith.addf %2, %4 : vector<8x128xf32>
    %c0_5 = arith.constant 0 : index
    %c0_6 = arith.constant 0 : index
    %6 = vector.load %arg6[%c0_5, %c0_6] : memref<8x128xf32, #tpu.memory_space<vmem>>, vector<8x128xf32>
    tpu.vector_store %arg6[%c0_5, %c0_6], %5 {strides = array<i32>} : memref<8x128xf32, #tpu.memory_space<vmem>>, vector<8x128xf32>,
    return
  }
  func.func @transform_0(%arg0: i32, %arg1: i32, %arg2: i32) -> (i32, i32) {
    %c0_i32 = arith.constant 0 : i32
    return %arg1, %arg2 : i32, i32
  }
  func.func @transform_1(%arg0: i32, %arg1: i32, %arg2: i32) -> (i32, i32) {
    %c0_i32 = arith.constant 0 : i32
    return %arg2, %arg0 : i32, i32
  }
  func.func @transform_2(%arg0: i32, %arg1: i32, %arg2: i32) -> (i32, i32) {
    %c0_i32 = arith.constant 0 : i32
    %c0_i32_0 = arith.constant 0 : i32
    return %c0_i32, %arg0 : i32, i32
  }
  func.func @transform_3(%arg0: i32, %arg1: i32, %arg2: i32) -> (i32, i32) {
    %c0_i32 = arith.constant 0 : i32
    return %arg1, %arg0 : i32, i32
  }
}

</mosaic_0001>

<bundles_post_ra>
// kernel: classifier_forward.1
= control target key start
LH: loop header
LB: loop body
LE: loop exit
PB: predicated region body
PF: predicated region fallthrough
CT: control target
= control target key end

     0   :  { %8 = vsyncpa [#allocation3], 0  ;;  %s916_s0 = inlined_call_operand.hbm [shape: f32[16,32], index: 0, kind: input, shape index: {}]   ;;  %s917_s1 = inlined_call_operand.hbm [shape: f32[32,128], index: 1, kind: input, shape index: {}]   ;;  %s918_s2 = inlined_call_operand.vmem [shape: f32[1,128], index: 2, kind: input, shape index: {}]   ;;  %s919_s3 = inlined_call_operand.hbm [shape: f32[16,128], index: 3, kind: output, shape index: {}]  }
   0x1   :  { %10 = vsyncpa [#allocation3 + $0x1], 0 }
   0x2   :  { %11 = vsyncpa [#allocation6], 0 }
   0x3   :  { %12 = vsyncpa [#allocation4], 0 }
   0x4   :  { %14 = vsyncpa [#allocation4 + $0x1], 0  ;;  %s740_s12 = smov 0   ;;  %s742_s13 = smov 0  }
   0x5   :  { %s744_s14 = smov 0   ;;  %s746_s15 = smov 0  }
   0x6   :  { %s748_s16 = smov 0   ;;  %s750_s17 = smov 0  }
   0x7 LB: > { %s462_s18 = sadd.s32 4294967295, %s711_s17   ;;  %s463_s19 = sadd.s32 4294967294, %s711_s17   ;;  %s711_s17 = sphi %s750_s17, %s20_s17   ;;  %s707_s16 = sphi %s748_s16, %s937_s16   ;;  %s703_s15 = sphi %s746_s15, %s936_s15   ;;  %s699_s14 = sphi %s744_s14, %s935_s14   ;;  %s695_s13 = sphi %s742_s13, %s934_s13   ;;  %s691_s12 = sphi %s740_s12, %s933_s12  }
   0x8   : > { %p61_p0 = scmp.ne.s32.totalorder %s695_s13, %s691_s12  ;;  %p774_p1 = scmp.eq.s32.totalorder %s462_s18, 0 }
   0x9   : > { %p778_p2 = scmp.eq.s32.totalorder %s462_s18, 1  ;;  %p147_p3 = scmp.eq.s32.totalorder %s463_s19, 1 }
   0xa   : > { %p784_p4 = por %p774_p1, %p61_p0  ;;  %p464_p5 = scmp.ge.s32.totalorder %s711_s17, 1 }
   0xb   : > { %p789_p6 = por %p147_p3, %p61_p0  ;;  %p154_p7 = scmp.lt.s32.totalorder %s711_s17, 3 }
   0xc   : > { %s923_s22 = scalar_select %p784_p4, 1, 0 }
   0xd   : > { %s924_s23 = scalar_select %p789_p6, 1, 0 }
   0xe   : > { %p794_p8 = pnand %p464_p5, %p154_p7  ;;  %s713_s25 = smov [#allocation5]  }
   0xf   : > { %s170_s26 = sshll.u32 %s713_s25, 4  ;;  %s35_s28 = sadd.s32 1, %s707_s16  ;;  %s171_s26 = int_to_ptr.vmem [resolvable:$true] %s170_s26 }
  0x10   : > { %p504_p9 = pneg %p794_p8  ;;  %s584_s29 = scalar_lea.vmem %s171_s26, 512 }
  0x11   : > { %p585_p13 = scmp.ne.s32.totalorder %s171_s26, %s584_s29  ;;  %p592_p5 = scmp.lt.s32.totalorder %s171_s26, %s171_s26 }
  0x12   : > { %p803_p11 = pnand %p504_p9, %p774_p1  ;;  %p593_p7 = scmp.lt.s32.totalorder %s584_s29, %s584_s29 }
  0x14   : > { %p575_p12 = pneg %p803_p11  ;;  %p594_p6 = por %p593_p7, %p592_p5 }
  0x16   : > { %p587_p0 = pnand %p585_p13, %p575_p12 }
  0x18   : > { %p588_p3 = pneg %p587_p0 }
  0x1a   : > { %p595_p4 = pnand %p594_p6, %p588_p3 }
  0x1c   : > { %598 = shalt.err (!%p595_p4)
}
  0x1d   : > { %s714_s30 = smov 128   ;;  %s715_s4 = smov 8  }
  0x1e   : > { %507 = dma.hbm_to_vmem [thread:$0]  (!%p803_p11), %s917_s1, 512, %s171_s26, [#allocation6], %s714_s30, %s714_s30, %s715_s4  }
  0x1f   : > { %p37_p6 = scmp.ge.s32.totalorder %s35_s28, 2  ;;  %s48_s7 = sadd.s32 1, %s699_s14 }
  0x20   : > { %p55_p4 = scmp.ne.s32.totalorder %s699_s14, %s695_s13  ;;  %p56_p9 = scmp.eq.s32.totalorder %s711_s17, 0 }
  0x21   : > { %s939_s28 = smov (%p37_p6, %s35_s28), 0  ;;  %p517_p0 = scmp.lt.s32.totalorder %s711_s17, 2 }
  0x22   : > { %p821_p12 = por %p56_p9, %p55_p4  ;;  %p827_p13 = por %p778_p2, %p55_p4 }
  0x23   : > { %s43_s10 = ssub.s32 %s707_s16, %s939_s28  ;;  %s190_s11 = sand.u32 1, %s699_s14  }
  0x24   : > { %p46_p11 = scmp.eq.s32.totalorder %s43_s10, 0  ;;  %s468_s18 = sshll.u32 %s190_s11, 3 }
  0x25   : > { %s469_s25 = sshll.u32 %s707_s16, 7  ;;  %s194_s30 = scalar_lea.vmem [#allocation2], %s468_s18 }
  0x26   : > { %s836_s19 = scalar_select %p46_p11, %s699_s14, %s48_s7  }
  0x27   : > { %s200_s29 = scalar_lea.hbm %s916_s0, %s469_s25  ;;  %s202_s4 = sshll.u32 %s194_s30, 4  ;;  %s203_s4 = int_to_ptr.vmem [resolvable:$true] %s202_s4 }
  0x28   : > { %p844_p2 = pnand %p517_p0, %p821_p12  ;;  %s191_s5 = scalar_lea.sflag [#allocation3], %s190_s11 }
  0x29   : > { %s612_s6 = scalar_lea.vmem %s203_s4, 128  ;;  %s716_s7 = smov [#allocation2]  }
  0x2a   : > { %p601_p3 = pneg %p844_p2  ;;  %p613_p5 = scmp.ne.s32.totalorder %s203_s4, %s612_s6 }
  0x2b   : > { %s617_s10 = sshll.u32 %s716_s7, 4  ;;  %s618_s10 = int_to_ptr.vmem [resolvable:$false] %s617_s10 }
  0x2c   : > { %p615_p7 = pnand %p613_p5, %p601_p3  ;;  %s619_s25 = scalar_lea.vmem %s618_s10, 256 }
  0x2d   : > { %p620_p4 = scmp.lt.s32.totalorder %s203_s4, %s618_s10  ;;  %p621_p9 = scmp.lt.s32.totalorder %s619_s25, %s612_s6 }
  0x2e   : > { %p616_p6 = pneg %p615_p7 }
  0x2f   : > { %p622_p11 = por %p621_p9, %p620_p4 }
  0x31   : > { %p623_p10 = pnand %p622_p11, %p616_p6 }
  0x33   : > { %626 = shalt.err (!%p623_p10)
}
  0x34   : > { %511 = dma.hbm_to_vmem [thread:$0]  (!%p844_p2), %s200_s29, 128, %s203_s4, %s191_s5  }
  0x35   : > { %211 = sbr.rel (%p794_p8) target bundleno = 278 (0x116), region = 32  ;;  %s855_s8 = sand.u32 (!%p794_p8), 1, %s695_s13  }
  0x36   : > { %s471_s11 = sshll.u32 (!%p794_p8), %s855_s8, 3  ;;  %s214_s18 = scalar_lea.sflag (!%p794_p8), [#allocation3], %s855_s8 }
  0x37   : > { %s217_s26 = scalar_lea.vmem (!%p794_p8), [#allocation2], %s471_s11  ;;  %p930_p12 = scmp.ne.s32.totalorder (!%p794_p8), %s923_s22, 0 }
  0x3a   : > { %678 = dma.done.wait (%p930_p12), %s214_s18, 128  }
  0x3b   : > { %680 = vsyncadd (%p930_p12), %s214_s18, 4294967168 }
  0x3c   : > { %682 = dma.done.wait (%p774_p1), [#allocation6], 512  }
  0x3d   : > { %684 = vsyncadd (%p774_p1), [#allocation6], 4294966784  ;;  %v717_v0 = vmov 0.0   ;;  %vm718_vm0 = vmmov 0   ;;  %v255_v1 = vld [vmem:[#allocation5 + $0x18] sm:$0xff]  ;;  %v254_v2 = vld [vmem:[#allocation5 + $0x10] sm:$0xff] }
  0x3e   : > { %485 = vmatprep.subr.mxu0 %v717_v0  ;;  %493 = vmatprep.mubr.msk.f32.mxu0 %vm718_vm0, %v717_v0  ;;  %v253_v3 = vld [vmem:[#allocation5 + $0x8] sm:$0xff]  ;;  %v252_v4 = vld [vmem:[#allocation5] sm:$0xff]  ;;  %v251_v5 = vld [vmem:[%s217_s26] sm:$0xff]  ;;  %vm263_vm1 = vcmask 261120   ;;  %s477_s24 = sshll.u32 %s703_s15, 7  ;;  %s246_s27 = scalar_lea.vmem [#allocation7], %s471_s11 }
  0x3f   : > { %486 = vmatpush3.msra.mxu0 %v255_v1  ;;  %v474_v6 = vld [vmem:[%s918_s2] ss:$0 sm:$0xff]  ;;  %s353_s29 = sshll.u32 %s246_s27, 4  ;;  %s874_s21 = scalar_lea.hbm %s919_s3, %s477_s24  ;;  %s354_s29 = int_to_ptr.vmem [resolvable:$true] %s353_s29 }
  0x40   : > { %487 = vmatprep.subr.mxu0 %v717_v0  ;;  %s339_s5 = scalar_lea.sflag [#allocation4], %s855_s8  ;;  %s627_s6 = scalar_lea.vmem %s354_s29, 128 }
  0x41   : > { %488 = vmatpush3.msra.mxu0 %v254_v2  ;;  %p628_p1 = scmp.ne.s32.totalorder %s354_s29, %s627_s6  ;;  %s719_s7 = smov [#allocation7]  }
  0x42   : > { %489 = vmatprep.subr.mxu0 %v717_v0  ;;  %s631_s15 = sshll.u32 %s719_s7, 4  ;;  %s632_s15 = int_to_ptr.vmem [resolvable:$false] %s631_s15 }
  0x43   : > { %490 = vmatpush3.msra.mxu0 %v253_v3  ;;  %p629_p8 = pnand %p628_p1, %p827_p13  ;;  %s633_s10 = scalar_lea.vmem %s632_s15, 256 }
  0x44   : > { %491 = vmatprep.subr.mxu0 %v717_v0  ;;  %p634_p0 = scmp.lt.s32.totalorder %s354_s29, %s632_s15  ;;  %p635_p2 = scmp.lt.s32.totalorder %s633_s10, %s627_s6 }
  0x45   : > { %492 = vmatpush3.msra.mxu0 %v252_v4  ;;  %p630_p10 = pneg %p629_p8 }
  0x46   : > { %494 = vmatmul.mubr.msk.f32.vlgmr.msra.gmra.mxu0 %vm263_vm1, %v251_v5  ;;  %p636_p3 = por %p635_p2, %p634_p0 }
  0x48   : > { %p637_p5 = pnand %p636_p3, %p630_p10 }
 0x106   : > { %v333_v7 = vpop.f32.mrf.mxu0 }
 0x107   : > { %v334_v8 = vadd.f32 %v474_v6, %v333_v7 }
 0x108   : > { %v495_v9 = vpop.f32.mrf.mxu0 }
 0x109   : > { %337 = vst [vmem:[%s246_s27] sm:$0xff] %v334_v8 }
 0x10a   : > { %640 = shalt.err (!%p637_p5)
}
 0x10b   : > { %s641_s25 = scalar_lea.hbm %s874_s21, 128  ;;  %s645_s18 = scalar_lea.hbm %s919_s3, 256 }
 0x10c   : > { %p642_p7 = scmp.ne.s32.totalorder %s874_s21, %s641_s25  ;;  %p646_p9 = scmp.lt.s32.totalorder %s874_s21, %s919_s3 }
 0x10d   : > { %p647_p11 = scmp.lt.s32.totalorder %s645_s18, %s641_s25 }
 0x10e   : > { %p643_p6 = pnand %p642_p7, %p827_p13 }
 0x10f   : > { %p648_p12 = por %p647_p11, %p646_p9 }
 0x110   : > { %p644_p4 = pneg %p643_p6 }
 0x112   : > { %p649_p1 = pnand %p648_p12, %p644_p4 }
 0x114   : > { %652 = shalt.err (!%p649_p1)
}
 0x115   : > { %502 = dma.vmem_to_hbm [thread:$0]  (%p827_p13), %s354_s29, 128, %s874_s21, %s339_s5  }
 0x116 PF: > { %s365_s22 = sand.u32 1, %s691_s12   ;;  %p931_p8 = scmp.ne.s32.totalorder %s924_s23, 0 }
 0x117   : > { %p932_p10 = scmp.ge.s32.totalorder %s711_s17, 2  ;;  %s366_s24 = scalar_lea.sflag [#allocation4], %s365_s22 }
 0x119   : > { %p513_p0 = pnand %p932_p10, %p931_p8 }
 0x11b   : > { %p514_p2 = pneg %p513_p0 }
 0x11d   : > { %686 = dma.done.wait (%p514_p2), %s366_s24, 128  }
 0x11e   : > { %688 = vsyncadd (%p514_p2), %s366_s24, 4294967168  ;;  %s20_s17 = sadd.s32 1, %s711_s17   ;;  %s933_s12 = smov %s695_s13 }
 0x11f   : > { %p17_p3 = scmp.ge.s32.totalorder %s20_s17, 4   ;;  %s934_s13 = smov %s699_s14 }
 0x120   : > { %s935_s14 = smov %s836_s19  ;;  %s936_s15 = smov %s707_s16 }
 0x121   : > { %s937_s16 = smov %s939_s28  ;;  %19 = sbr.rel (!%p17_p3) target bundleno = 7 (0x7), region = 85 }
 0x126   :  { %371 = vsyncpa [#allocation3], 1 }
 0x127   :  { %373 = vsyncpa [#allocation3 + $0x1], 1 }
 0x128   :  { %374 = vsyncpa [#allocation6], 1 }
 0x129   :  { %375 = vsyncpa [#allocation4], 1 }
 0x12a   :  { %377 = vsyncpa [#allocation4 + $0x1], 1 }

</bundles_post_ra>
